<compile_context>
chip_gen: v7x
topology: tpu7x:2x2x1
jax: 0.10.0
libtpu: 0.0.40
codegen_flags: <defaults>
</compile_context>

<pallas_src>
import numpy as np
import jax
import jax.numpy as jnp
from jax import lax
from jax.experimental import pallas as pl
from jax.experimental.pallas import tpu as pltpu


def _round_up(x, m):
    return (x + m - 1) // m * m


def _multi_tensorcore():
    """True on chips with >1 TensorCore (v7x) -> split the batch across TCs."""
    try:
        kind = jax.devices()[0].device_kind.lower()
    except Exception:
        return False
    return "7" in kind


# ----------------------- fused conv3x3 Pallas forward ---------------------- #

def _conv3x3_forward_impl(x, w_aug, *, per_batch):
    """3x3 / stride-1 / pad-1 conv with bias.  NCHW in -> NCHW out (f32).

    w_aug: (Cout, Kp) tap-major weights; column 9*C is the bias (contracted
    against a ones row in the stacked RHS), columns beyond 9*C+1 are zero pad.
    """
    N, C, H, W = x.shape
    Cout, Kp = w_aug.shape
    K = 9 * C + 1                                  # 9 taps * C channels + bias
    assert Kp == _round_up(K, 8)

    # Row stride of the flattened padded image.  Must be >= W+2; round up so
    # Q = H*Wrow is a multiple of 128 (lane-dense, unmasked output stores)
    # whenever that is cheap.
    Wrow = W + 2
    lane_step = 128 // int(np.gcd(H, 128))
    Wrow_dense = _round_up(Wrow, lane_step)
    if Wrow_dense - Wrow <= 32:
        Wrow = Wrow_dense
    Q = H * Wrow                                   # kernel output lane extent

    # One zero-pad (top + bottom rows, left + right cols); the reshape below
    # is contiguous (free).  Hp = H+3 bottom-extends the buffer so the
    # farthest shifted read (tap (2,2): index (H+2)*Wrow + 1) stays in bounds.
    Hp = H + 3
    Mp = Hp * Wrow
    xp = jnp.pad(x, ((0, 0), (0, 0), (1, Hp - H - 1), (1, Wrow - W - 1)))
    xf = xp.reshape(N, C, Mp)

    nblk = 1 if per_batch else N                   # images per grid step
    grid = (N,) if per_batch else (1,)
    semantics = ("parallel",) if per_batch else ("arbitrary",)
    if per_batch:
        x_map = lambda n: (n, 0, 0)
        o_map = lambda n: (n, 0, 0)
    else:
        x_map = lambda n: (0, 0, 0)
        o_map = lambda n: (0, 0, 0)

    def kernel(xf_ref, w_ref, o_ref, rhs_ref):
        # xf_ref : (nblk, C, Mp)   flattened zero-padded image(s)
        # w_ref  : (Cout, Kp)      tap-major weights, col 9*C = bias, rest 0
        # o_ref  : (nblk, Cout, Q) columns w >= W are junk (sliced off outside)
        # rhs_ref: (Kp, Q)         VMEM scratch for the stacked im2col RHS
        rhs_ref[pl.ds(9 * C, 1), :] = jnp.ones((1, Q), jnp.float32)  # bias row
        if Kp > K:                                 # zero the K-padding rows
            rhs_ref[pl.ds(K, Kp - K), :] = jnp.zeros((Kp - K, Q), jnp.float32)
        for n in range(nblk):                      # static unroll (1 or N)
            # Fused im2col: 9 shifted (C, Q) windows stacked on the sublane
            # (contraction) axis of the RHS scratch.
            for dh in range(3):
                for dw in range(3):
                    t = dh * 3 + dw
                    rhs_ref[pl.ds(t * C, C), :] = (
                        xf_ref[n, :, pl.ds(dh * Wrow + dw, Q)])
            # One (Cout, Kp) @ (Kp, Q) MXU dot per image; bias folded in.
            o_ref[n, :, :] = jnp.dot(
                w_ref[...], rhs_ref[...],
                preferred_element_type=jnp.float32).astype(o_ref.dtype)

    cost = pl.CostEstimate(
        flops=2 * N * Cout * Q * K,
        transcendentals=0,
        bytes_accessed=4 * (N * C * Mp + Cout * Kp + N * Cout * Q),
    )

    out_q = pl.pallas_call(
        kernel,
        out_shape=jax.ShapeDtypeStruct((N, Cout, Q), jnp.float32),
        grid_spec=pltpu.PrefetchScalarGridSpec(
            num_scalar_prefetch=0,
            grid=grid,
            in_specs=[
                pl.BlockSpec((nblk, C, Mp), x_map),
                pl.BlockSpec((Cout, Kp), lambda n: (0, 0)),
            ],
            out_specs=pl.BlockSpec((nblk, Cout, Q), o_map),
            scratch_shapes=[pltpu.VMEM((Kp, Q), jnp.float32)],
        ),
        compiler_params=pltpu.CompilerParams(dimension_semantics=semantics),
        cost_estimate=cost,
    )(xf, w_aug)

    # (N, Cout, Q) -> (N, Cout, H, W): drop the padded columns.  Output is
    # already NCHW -- no transpose.  (If this fed another fused op we would
    # keep the Wrow-strided layout and slice only at the model boundary.)
    return out_q.reshape(N, Cout, H, Wrow)[:, :, :, :W]


_conv3x3_forward = jax.jit(_conv3x3_forward_impl, static_argnames=("per_batch",))


# --------------------------- Wrapped conv "op" ----------------------------- #

class PallasConv2d3x3:
    """Conv2d(Cin, Cout, 3, stride=1, padding=1, bias=True); NCHW layout."""

    def __init__(self, cin, cout, key):
        k1, k2 = jax.random.split(key)
        fan_in = cin * 3 * 3
        bound = 1.0 / np.sqrt(fan_in)
        # PyTorch-style (Cout, Cin, kh, kw) weight, deterministic init.
        self.weight = jax.random.uniform(
            k1, (cout, cin, 3, 3), jnp.float32, -bound, bound)
        self.bias = jax.random.uniform(k2, (cout,), jnp.float32, -bound, bound)
        # Hoisted once: (Cout, Cin, kh, kw) -> (Cout, kh, kw, Cin)
        #   -> (Cout, 9*Cin), tap index t = kh*3 + kw; append the bias as an
        # extra K column (dotted against a ones RHS row), then zero-pad K to a
        # multiple of 8 so the stacked RHS is fully defined / aligned.
        wmat = jnp.transpose(self.weight, (0, 2, 3, 1)).reshape(cout, 9 * cin)
        w_aug = jnp.concatenate([wmat, self.bias[:, None]], axis=1)
        kp = _round_up(w_aug.shape[1], 8)
        self.w_aug = jnp.pad(w_aug, ((0, 0), (0, kp - w_aug.shape[1])))
        self.cin, self.cout = cin, cout
        # v7x (2 TCs/chip): per-image "parallel" grid.  v5e/v6e (1 TC): fold
        # the whole batch into a single grid step.
        self.per_batch = _multi_tensorcore()

    def __call__(self, x_nchw):
        assert x_nchw.shape[1] == self.cin
        return _conv3x3_forward(x_nchw, self.w_aug, per_batch=self.per_batch)


# ------------------------------ Op wrapper --------------------------------- #

class Op:
    """JAX port of implicit/Ops.py::Op — pure pass-through wrapper recording
    input/output shapes."""

    def __init__(self, op):
        self.op = op
        if not callable(op):
            print('INFO: {} is not a callable op'.format(self.op))
        self.in_shape = None
        self.out_shape = None

    def forward(self, input):
        self.in_shape = np.array(input.shape)
        output = self.op(input)
        self.out_shape = np.array(output.shape)
        return output

    __call__ = forward

    def in_size(self):
        return int(np.prod(self.in_shape[1:]))

    def out_size(self):
        return int(np.prod(self.out_shape[1:]))


# --------------------------------- main ------------------------------------ #

if __name__ == "__main__":
    key = jax.random.PRNGKey(0)
    kx, kw = jax.random.split(key)

    N, C, H, W = 2, 4, 16, 16
    x = jax.random.normal(kx, (N, C, H, W), jnp.float32)

    conv = PallasConv2d3x3(cin=C, cout=8, key=kw)
    op = Op(conv)

    y = op(x)
    y = jax.block_until_ready(y)

    # Reference check against XLA's conv (NCHW / OIHW).
    y_ref = lax.conv_general_dilated(
        x, conv.weight, window_strides=(1, 1), padding=((1, 1), (1, 1)),
        dimension_numbers=('NCHW', 'OIHW', 'NCHW'))
    y_ref = y_ref + conv.bias.reshape(1, -1, 1, 1)

    assert y.shape == (N, 8, H, W), y.shape
    assert op.in_size() == C * H * W
    assert op.out_size() == 8 * H * W
    np.testing.assert_allclose(np.asarray(y), np.asarray(y_ref),
                               rtol=1e-4, atol=1e-4)

    print("KERNEL_OK")
</pallas_src>

<mosaic_0001>
module attributes {stable_mosaic.version = 11 : i64} {
  func.func @kernel(%arg0: i32, %arg1: memref<2x4x456xf32, #tpu.memory_space<vmem>>, %arg2: memref<8x40xf32, #tpu.memory_space<vmem>>, %arg3: memref<2x8x384xf32, #tpu.memory_space<vmem>>, %arg4: memref<40x384xf32, #tpu.memory_space<vmem>>) attributes {dimension_semantics = [#tpu.dimension_semantics<arbitrary>], iteration_bounds = array<i64: 1>, scalar_prefetch = 0 : i64, scratch_operands = 1 : i64, tpu.core_type = #tpu.core_type<tc>, window_params = [{pipeline_mode = #tpu.pipeline_mode<synchronous>, transform_indices = @transform_0, window_bounds = array<i64: 2, 4, 456>}, {pipeline_mode = #tpu.pipeline_mode<synchronous>, transform_indices = @transform_1, window_bounds = array<i64: 8, 40>}, {pipeline_mode = #tpu.pipeline_mode<synchronous>, transform_indices = @transform_2, window_bounds = array<i64: 2, 8, 384>}]} {
    %cst = arith.constant 1.000000e+00 : f32
    %0 = vector.broadcast %cst : f32 to vector<1x384xf32>
    %c36 = arith.constant 36 : index
    %c0 = arith.constant 0 : index
    %1 = vector.load %arg4[%c36, %c0] : memref<40x384xf32, #tpu.memory_space<vmem>>, vector<1x384xf32>
    tpu.vector_store %arg4[%c36, %c0], %0 {strides = array<i32>} : memref<40x384xf32, #tpu.memory_space<vmem>>, vector<1x384xf32>,
    %cst_0 = arith.constant 0.000000e+00 : f32
    %2 = vector.broadcast %cst_0 : f32 to vector<3x384xf32>
    %c37 = arith.constant 37 : index
    %c0_1 = arith.constant 0 : index
    %3 = vector.load %arg4[%c37, %c0_1] : memref<40x384xf32, #tpu.memory_space<vmem>>, vector<3x384xf32>
    tpu.vector_store %arg4[%c37, %c0_1], %2 {strides = array<i32>} : memref<40x384xf32, #tpu.memory_space<vmem>>, vector<3x384xf32>,
    %c0_2 = arith.constant 0 : index
    %c0_3 = arith.constant 0 : index
    %c0_4 = arith.constant 0 : index
    %4 = vector.load %arg1[%c0_2, %c0_3, %c0_4] : memref<2x4x456xf32, #tpu.memory_space<vmem>>, vector<1x4x384xf32>
    %5 = vector.shape_cast %4 : vector<1x4x384xf32> to vector<4x384xf32>
    %c0_5 = arith.constant 0 : index
    %c0_6 = arith.constant 0 : index
    %6 = vector.load %arg4[%c0_5, %c0_6] : memref<40x384xf32, #tpu.memory_space<vmem>>, vector<4x384xf32>
    tpu.vector_store %arg4[%c0_5, %c0_6], %5 {strides = array<i32>} : memref<40x384xf32, #tpu.memory_space<vmem>>, vector<4x384xf32>,
    %c0_7 = arith.constant 0 : index
    %c0_8 = arith.constant 0 : index
    %c1 = arith.constant 1 : index
    %7 = vector.load %arg1[%c0_7, %c0_8, %c1] : memref<2x4x456xf32, #tpu.memory_space<vmem>>, vector<1x4x384xf32>
    %8 = vector.shape_cast %7 : vector<1x4x384xf32> to vector<4x384xf32>
    %c4 = arith.constant 4 : index
    %c0_9 = arith.constant 0 : index
    %9 = vector.load %arg4[%c4, %c0_9] : memref<40x384xf32, #tpu.memory_space<vmem>>, vector<4x384xf32>
    tpu.vector_store %arg4[%c4, %c0_9], %8 {strides = array<i32>} : memref<40x384xf32, #tpu.memory_space<vmem>>, vector<4x384xf32>,
    %c0_10 = arith.constant 0 : index
    %c0_11 = arith.constant 0 : index
    %c2 = arith.constant 2 : index
    %10 = vector.load %arg1[%c0_10, %c0_11, %c2] : memref<2x4x456xf32, #tpu.memory_space<vmem>>, vector<1x4x384xf32>
    %11 = vector.shape_cast %10 : vector<1x4x384xf32> to vector<4x384xf32>
    %c8 = arith.constant 8 : index
    %c0_12 = arith.constant 0 : index
    %12 = vector.load %arg4[%c8, %c0_12] : memref<40x384xf32, #tpu.memory_space<vmem>>, vector<4x384xf32>
    tpu.vector_store %arg4[%c8, %c0_12], %11 {strides = array<i32>} : memref<40x384xf32, #tpu.memory_space<vmem>>, vector<4x384xf32>,
    %c0_13 = arith.constant 0 : index
    %c0_14 = arith.constant 0 : index
    %c24 = arith.constant 24 : index
    %13 = vector.load %arg1[%c0_13, %c0_14, %c24] : memref<2x4x456xf32, #tpu.memory_space<vmem>>, vector<1x4x384xf32>
    %14 = vector.shape_cast %13 : vector<1x4x384xf32> to vector<4x384xf32>
    %c12 = arith.constant 12 : index
    %c0_15 = arith.constant 0 : index
    %15 = vector.load %arg4[%c12, %c0_15] : memref<40x384xf32, #tpu.memory_space<vmem>>, vector<4x384xf32>
    tpu.vector_store %arg4[%c12, %c0_15], %14 {strides = array<i32>} : memref<40x384xf32, #tpu.memory_space<vmem>>, vector<4x384xf32>,
    %c0_16 = arith.constant 0 : index
    %c0_17 = arith.constant 0 : index
    %c25 = arith.constant 25 : index
    %16 = vector.load %arg1[%c0_16, %c0_17, %c25] : memref<2x4x456xf32, #tpu.memory_space<vmem>>, vector<1x4x384xf32>
    %17 = vector.shape_cast %16 : vector<1x4x384xf32> to vector<4x384xf32>
    %c16 = arith.constant 16 : index
    %c0_18 = arith.constant 0 : index
    %18 = vector.load %arg4[%c16, %c0_18] : memref<40x384xf32, #tpu.memory_space<vmem>>, vector<4x384xf32>
    tpu.vector_store %arg4[%c16, %c0_18], %17 {strides = array<i32>} : memref<40x384xf32, #tpu.memory_space<vmem>>, vector<4x384xf32>,
    %c0_19 = arith.constant 0 : index
    %c0_20 = arith.constant 0 : index
    %c26 = arith.constant 26 : index
    %19 = vector.load %arg1[%c0_19, %c0_20, %c26] : memref<2x4x456xf32, #tpu.memory_space<vmem>>, vector<1x4x384xf32>
    %20 = vector.shape_cast %19 : vector<1x4x384xf32> to vector<4x384xf32>
    %c20 = arith.constant 20 : index
    %c0_21 = arith.constant 0 : index
    %21 = vector.load %arg4[%c20, %c0_21] : memref<40x384xf32, #tpu.memory_space<vmem>>, vector<4x384xf32>
    tpu.vector_store %arg4[%c20, %c0_21], %20 {strides = array<i32>} : memref<40x384xf32, #tpu.memory_space<vmem>>, vector<4x384xf32>,
    %c0_22 = arith.constant 0 : index
    %c0_23 = arith.constant 0 : index
    %c48 = arith.constant 48 : index
    %22 = vector.load %arg1[%c0_22, %c0_23, %c48] : memref<2x4x456xf32, #tpu.memory_space<vmem>>, vector<1x4x384xf32>
    %23 = vector.shape_cast %22 : vector<1x4x384xf32> to vector<4x384xf32>
    %c24_24 = arith.constant 24 : index
    %c0_25 = arith.constant 0 : index
    %24 = vector.load %arg4[%c24_24, %c0_25] : memref<40x384xf32, #tpu.memory_space<vmem>>, vector<4x384xf32>
    tpu.vector_store %arg4[%c24_24, %c0_25], %23 {strides = array<i32>} : memref<40x384xf32, #tpu.memory_space<vmem>>, vector<4x384xf32>,
    %c0_26 = arith.constant 0 : index
    %c0_27 = arith.constant 0 : index
    %c49 = arith.constant 49 : index
    %25 = vector.load %arg1[%c0_26, %c0_27, %c49] : memref<2x4x456xf32, #tpu.memory_space<vmem>>, vector<1x4x384xf32>
    %26 = vector.shape_cast %25 : vector<1x4x384xf32> to vector<4x384xf32>
    %c28 = arith.constant 28 : index
    %c0_28 = arith.constant 0 : index
    %27 = vector.load %arg4[%c28, %c0_28] : memref<40x384xf32, #tpu.memory_space<vmem>>, vector<4x384xf32>
    tpu.vector_store %arg4[%c28, %c0_28], %26 {strides = array<i32>} : memref<40x384xf32, #tpu.memory_space<vmem>>, vector<4x384xf32>,
    %c0_29 = arith.constant 0 : index
    %c0_30 = arith.constant 0 : index
    %c50 = arith.constant 50 : index
    %28 = vector.load %arg1[%c0_29, %c0_30, %c50] : memref<2x4x456xf32, #tpu.memory_space<vmem>>, vector<1x4x384xf32>
    %29 = vector.shape_cast %28 : vector<1x4x384xf32> to vector<4x384xf32>
    %c32 = arith.constant 32 : index
    %c0_31 = arith.constant 0 : index
    %30 = vector.load %arg4[%c32, %c0_31] : memref<40x384xf32, #tpu.memory_space<vmem>>, vector<4x384xf32>
    tpu.vector_store %arg4[%c32, %c0_31], %29 {strides = array<i32>} : memref<40x384xf32, #tpu.memory_space<vmem>>, vector<4x384xf32>,
    %c0_32 = arith.constant 0 : index
    %c0_33 = arith.constant 0 : index
    %31 = vector.load %arg2[%c0_32, %c0_33] : memref<8x40xf32, #tpu.memory_space<vmem>>, vector<8x40xf32>
    %c0_34 = arith.constant 0 : index
    %c0_35 = arith.constant 0 : index
    %32 = vector.load %arg4[%c0_34, %c0_35] : memref<40x384xf32, #tpu.memory_space<vmem>>, vector<40x384xf32>
    %cst_36 = arith.constant dense<0.000000e+00> : vector<8x384xf32>
    %33 = tpu.matmul %31, %32, %cst_36 {dimension_numbers = #tpu.dot_dimension_numbers<[1], [0], [0], [1], [0, 0, 1, 1], [], []>} : vector<8x40xf32>, vector<40x384xf32>, vector<8x384xf32> -> vector<8x384xf32>
    %c0_37 = arith.constant 0 : index
    %c0_38 = arith.constant 0 : index
    %c0_39 = arith.constant 0 : index
    %34 = vector.load %arg3[%c0_37, %c0_38, %c0_39] : memref<2x8x384xf32, #tpu.memory_space<vmem>>, vector<1x8x384xf32>
    %35 = vector.shape_cast %34 : vector<1x8x384xf32> to vector<8x384xf32>
    %36 = vector.shape_cast %33 : vector<8x384xf32> to vector<1x8x384xf32>
    tpu.vector_store %arg3[%c0_37, %c0_38, %c0_39], %36 {strides = array<i32>} : memref<2x8x384xf32, #tpu.memory_space<vmem>>, vector<1x8x384xf32>,
    %c1_40 = arith.constant 1 : index
    %c0_41 = arith.constant 0 : index
    %c0_42 = arith.constant 0 : index
    %37 = vector.load %arg1[%c1_40, %c0_41, %c0_42] : memref<2x4x456xf32, #tpu.memory_space<vmem>>, vector<1x4x384xf32>
    %38 = vector.shape_cast %37 : vector<1x4x384xf32> to vector<4x384xf32>
    %c0_43 = arith.constant 0 : index
    %c0_44 = arith.constant 0 : index
    %39 = vector.load %arg4[%c0_43, %c0_44] : memref<40x384xf32, #tpu.memory_space<vmem>>, vector<4x384xf32>
    tpu.vector_store %arg4[%c0_43, %c0_44], %38 {strides = array<i32>} : memref<40x384xf32, #tpu.memory_space<vmem>>, vector<4x384xf32>,
    %c1_45 = arith.constant 1 : index
    %c0_46 = arith.constant 0 : index
    %c1_47 = arith.constant 1 : index
    %40 = vector.load %arg1[%c1_45, %c0_46, %c1_47] : memref<2x4x456xf32, #tpu.memory_space<vmem>>, vector<1x4x384xf32>
    %41 = vector.shape_cast %40 : vector<1x4x384xf32> to vector<4x384xf32>
    %c4_48 = arith.constant 4 : index
    %c0_49 = arith.constant 0 : index
    %42 = vector.load %arg4[%c4_48, %c0_49] : memref<40x384xf32, #tpu.memory_space<vmem>>, vector<4x384xf32>
    tpu.vector_store %arg4[%c4_48, %c0_49], %41 {strides = array<i32>} : memref<40x384xf32, #tpu.memory_space<vmem>>, vector<4x384xf32>,
    %c1_50 = arith.constant 1 : index
    %c0_51 = arith.constant 0 : index
    %c2_52 = arith.constant 2 : index
    %43 = vector.load %arg1[%c1_50, %c0_51, %c2_52] : memref<2x4x456xf32, #tpu.memory_space<vmem>>, vector<1x4x384xf32>
    %44 = vector.shape_cast %43 : vector<1x4x384xf32> to vector<4x384xf32>
    %c8_53 = arith.constant 8 : index
    %c0_54 = arith.constant 0 : index
    %45 = vector.load %arg4[%c8_53, %c0_54] : memref<40x384xf32, #tpu.memory_space<vmem>>, vector<4x384xf32>
    tpu.vector_store %arg4[%c8_53, %c0_54], %44 {strides = array<i32>} : memref<40x384xf32, #tpu.memory_space<vmem>>, vector<4x384xf32>,
    %c1_55 = arith.constant 1 : index
    %c0_56 = arith.constant 0 : index
    %c24_57 = arith.constant 24 : index
    %46 = vector.load %arg1[%c1_55, %c0_56, %c24_57] : memref<2x4x456xf32, #tpu.memory_space<vmem>>, vector<1x4x384xf32>
    %47 = vector.shape_cast %46 : vector<1x4x384xf32> to vector<4x384xf32>
    %c12_58 = arith.constant 12 : index
    %c0_59 = arith.constant 0 : index
    %48 = vector.load %arg4[%c12_58, %c0_59] : memref<40x384xf32, #tpu.memory_space<vmem>>, vector<4x384xf32>
    tpu.vector_store %arg4[%c12_58, %c0_59], %47 {strides = array<i32>} : memref<40x384xf32, #tpu.memory_space<vmem>>, vector<4x384xf32>,
    %c1_60 = arith.constant 1 : index
    %c0_61 = arith.constant 0 : index
    %c25_62 = arith.constant 25 : index
    %49 = vector.load %arg1[%c1_60, %c0_61, %c25_62] : memref<2x4x456xf32, #tpu.memory_space<vmem>>, vector<1x4x384xf32>
    %50 = vector.shape_cast %49 : vector<1x4x384xf32> to vector<4x384xf32>
    %c16_63 = arith.constant 16 : index
    %c0_64 = arith.constant 0 : index
    %51 = vector.load %arg4[%c16_63, %c0_64] : memref<40x384xf32, #tpu.memory_space<vmem>>, vector<4x384xf32>
    tpu.vector_store %arg4[%c16_63, %c0_64], %50 {strides = array<i32>} : memref<40x384xf32, #tpu.memory_space<vmem>>, vector<4x384xf32>,
    %c1_65 = arith.constant 1 : index
    %c0_66 = arith.constant 0 : index
    %c26_67 = arith.constant 26 : index
    %52 = vector.load %arg1[%c1_65, %c0_66, %c26_67] : memref<2x4x456xf32, #tpu.memory_space<vmem>>, vector<1x4x384xf32>
    %53 = vector.shape_cast %52 : vector<1x4x384xf32> to vector<4x384xf32>
    %c20_68 = arith.constant 20 : index
    %c0_69 = arith.constant 0 : index
    %54 = vector.load %arg4[%c20_68, %c0_69] : memref<40x384xf32, #tpu.memory_space<vmem>>, vector<4x384xf32>
    tpu.vector_store %arg4[%c20_68, %c0_69], %53 {strides = array<i32>} : memref<40x384xf32, #tpu.memory_space<vmem>>, vector<4x384xf32>,
    %c1_70 = arith.constant 1 : index
    %c0_71 = arith.constant 0 : index
    %c48_72 = arith.constant 48 : index
    %55 = vector.load %arg1[%c1_70, %c0_71, %c48_72] : memref<2x4x456xf32, #tpu.memory_space<vmem>>, vector<1x4x384xf32>
    %56 = vector.shape_cast %55 : vector<1x4x384xf32> to vector<4x384xf32>
    %c24_73 = arith.constant 24 : index
    %c0_74 = arith.constant 0 : index
    %57 = vector.load %arg4[%c24_73, %c0_74] : memref<40x384xf32, #tpu.memory_space<vmem>>, vector<4x384xf32>
    tpu.vector_store %arg4[%c24_73, %c0_74], %56 {strides = array<i32>} : memref<40x384xf32, #tpu.memory_space<vmem>>, vector<4x384xf32>,
    %c1_75 = arith.constant 1 : index
    %c0_76 = arith.constant 0 : index
    %c49_77 = arith.constant 49 : index
    %58 = vector.load %arg1[%c1_75, %c0_76, %c49_77] : memref<2x4x456xf32, #tpu.memory_space<vmem>>, vector<1x4x384xf32>
    %59 = vector.shape_cast %58 : vector<1x4x384xf32> to vector<4x384xf32>
    %c28_78 = arith.constant 28 : index
    %c0_79 = arith.constant 0 : index
    %60 = vector.load %arg4[%c28_78, %c0_79] : memref<40x384xf32, #tpu.memory_space<vmem>>, vector<4x384xf32>
    tpu.vector_store %arg4[%c28_78, %c0_79], %59 {strides = array<i32>} : memref<40x384xf32, #tpu.memory_space<vmem>>, vector<4x384xf32>,
    %c1_80 = arith.constant 1 : index
    %c0_81 = arith.constant 0 : index
    %c50_82 = arith.constant 50 : index
    %61 = vector.load %arg1[%c1_80, %c0_81, %c50_82] : memref<2x4x456xf32, #tpu.memory_space<vmem>>, vector<1x4x384xf32>
    %62 = vector.shape_cast %61 : vector<1x4x384xf32> to vector<4x384xf32>
    %c32_83 = arith.constant 32 : index
    %c0_84 = arith.constant 0 : index
    %63 = vector.load %arg4[%c32_83, %c0_84] : memref<40x384xf32, #tpu.memory_space<vmem>>, vector<4x384xf32>
    tpu.vector_store %arg4[%c32_83, %c0_84], %62 {strides = array<i32>} : memref<40x384xf32, #tpu.memory_space<vmem>>, vector<4x384xf32>,
    %c0_85 = arith.constant 0 : index
    %c0_86 = arith.constant 0 : index
    %64 = vector.load %arg2[%c0_85, %c0_86] : memref<8x40xf32, #tpu.memory_space<vmem>>, vector<8x40xf32>
    %c0_87 = arith.constant 0 : index
    %c0_88 = arith.constant 0 : index
    %65 = vector.load %arg4[%c0_87, %c0_88] : memref<40x384xf32, #tpu.memory_space<vmem>>, vector<40x384xf32>
    %cst_89 = arith.constant dense<0.000000e+00> : vector<8x384xf32>
    %66 = tpu.matmul %64, %65, %cst_89 {dimension_numbers = #tpu.dot_dimension_numbers<[1], [0], [0], [1], [0, 0, 1, 1], [], []>} : vector<8x40xf32>, vector<40x384xf32>, vector<8x384xf32> -> vector<8x384xf32>
    %c1_90 = arith.constant 1 : index
    %c0_91 = arith.constant 0 : index
    %c0_92 = arith.constant 0 : index
    %67 = vector.load %arg3[%c1_90, %c0_91, %c0_92] : memref<2x8x384xf32, #tpu.memory_space<vmem>>, vector<1x8x384xf32>
    %68 = vector.shape_cast %67 : vector<1x8x384xf32> to vector<8x384xf32>
    %69 = vector.shape_cast %66 : vector<8x384xf32> to vector<1x8x384xf32>
    tpu.vector_store %arg3[%c1_90, %c0_91, %c0_92], %69 {strides = array<i32>} : memref<2x8x384xf32, #tpu.memory_space<vmem>>, vector<1x8x384xf32>,
    return
  }
  func.func @transform_0(%arg0: i32) -> (i32, i32, i32) {
    %c0_i32 = arith.constant 0 : i32
    %c0_i32_0 = arith.constant 0 : i32
    %c0_i32_1 = arith.constant 0 : i32
    %c0_i32_2 = arith.constant 0 : i32
    return %c0_i32, %c0_i32_0, %c0_i32_1 : i32, i32, i32
  }
  func.func @transform_1(%arg0: i32) -> (i32, i32) {
    %c0_i32 = arith.constant 0 : i32
    %c0_i32_0 = arith.constant 0 : i32
    %c0_i32_1 = arith.constant 0 : i32
    return %c0_i32, %c0_i32_0 : i32, i32
  }
  func.func @transform_2(%arg0: i32) -> (i32, i32, i32) {
    %c0_i32 = arith.constant 0 : i32
    %c0_i32_0 = arith.constant 0 : i32
    %c0_i32_1 = arith.constant 0 : i32
    %c0_i32_2 = arith.constant 0 : i32
    return %c0_i32, %c0_i32_0, %c0_i32_1 : i32, i32, i32
  }
}

</mosaic_0001>

<bundles_post_ra>
// kernel: _conv3x3_forward_impl.1
= control target key start
LH: loop header
LB: loop body
LE: loop exit
PB: predicated region body
PF: predicated region fallthrough
CT: control target
= control target key end

     0   :  { %s857_s13 = smov 126   ;;  %s858_s14 = smov 127   ;;  %v860_v7 = vmov 0.0|0.0   ;;  %v11_v8 = vlaneseq  ;;  %v865_v9 = vmov 1.0   ;;  %v866_v10 = vmov 0.0   ;;  %s1090_s0 = inlined_call_operand.vmem [shape: f32[2,4,456], index: 0, kind: input, shape index: {}]   ;;  %s1091_s1 = inlined_call_operand.vmem [shape: f32[8,40], index: 1, kind: input, shape index: {}]   ;;  %s1092_s2 = inlined_call_operand.vmem [shape: f32[2,8,384], index: 2, kind: output, shape index: {}]  }
   0x1   :  { %v54_v0 = vld [vmem:[%s1090_s0 + $0x8] sm:$0xff]  ;;  %v890_v1 = vld [vmem:[%s1090_s0] sm:$0xff]  ;;  %s859_s17 = smov 104   ;;  %817 = vmatprep.subr.bf16.mxu1 %v860_v7  ;;  %s861_s18 = smov 103   ;;  %19 = vst [vmem:[#allocation2 + $0x68] sm:$0xe0] %v866_v10  ;;  %305 = vmatprep.mubr.f32.mxu0 %v866_v10 }
   0x2   :  { %63 = vrot.lane.b32.xlu1 %v54_v0, %s857_s13  ;;  %37 = vrot.lane.b32.xlu0 %v890_v1, %s858_s14  ;;  %v57_v2 = vcombine.high %v890_v1, %v890_v1  ;;  %26 = vst [vmem:[#allocation2] sm:$0xf] %v890_v1  ;;  %v34_v3 = vcombine.low %v54_v0, %v54_v0  ;;  %v22_v4 = vld [vmem:[%s1090_s0 + $0x8] sm:$0xf]  ;;  %s862_s19 = smov 102   ;;  %s863_s20 = smov 80  }
   0x3   :  { %28 = vst [vmem:[#allocation2 + $0x10] sm:$0xf] %v22_v4  ;;  %v33_v5 = vcombine.low %v890_v1, %v890_v1  ;;  %v58_v6 = vcombine.high %v54_v0, %v54_v0  ;;  %s864_s21 = smov 79   ;;  %vm13_vm0 = vcmp.lt.s32.totalorder %v11_v8, 384  ;;  %18 = vst [vmem:[#allocation2 + $0x60] sm:$0xe0] %v866_v10 }
   0x4   :  { %27 = vst [vmem:[#allocation2 + $0x8] sm:$0xf] %v57_v2  ;;  %16 = vst.msk [vmem:[#allocation2 + $0x64] ss:$8 sm:$0x7] %vm13_vm0, %v865_v9  ;;  %v751_v11 = vld [vmem:[%s1090_s0 + $0x18] sm:$0xff] }
   0x5   :  { %20 = vst [vmem:[#allocation2 + $0x70] sm:$0xe0] %v866_v10  ;;  %s867_s24 = smov 78   ;;  %v399_v12 = vcombine.low %v751_v11, %v751_v11  ;;  %v948_v13 = vld [vmem:[%s1090_s0 + $0x10] sm:$0xff]  ;;  %v422_v16 = vcombine.high %v751_v11, %v751_v11  ;;  %vm868_vm1 = vmmov 0   ;;  %vm67_vm2 = vcmask 1031168  }
   0x6   :  { %61 = vrot.lane.b32.xlu1 %v57_v2, %s857_s13  ;;  %39 = vrot.lane.b32.xlu0 %v34_v3, %s858_s14  ;;  %v421_v14 = vcombine.high %v948_v13, %v948_v13  ;;  %v398_v15 = vcombine.low %v948_v13, %v948_v13  ;;  %vm43_vm3 = vcmask 1039360   ;;  %vm91_vm4 = vcmask 850944   ;;  %v749_v42 = vld [vmem:[%s1090_s0 + $0x18] sm:$0xf] }
   0x7   :  { %793 = vmatprep.mubr.msk.f32.mxu1 %vm868_vm1, %v866_v10  ;;  %vm115_vm5 = vcmask 842752   ;;  %vm139_vm6 = vcmask 834560   ;;  %vm163_vm7 = vcmask 654336   ;;  %vm187_vm8 = vcmask 646144  }
   0x8   :  { %vm211_vm9 = vcmask 637952   ;;  %vm237_vm10 = vcmask 326656  }
   0xa   :  { %87 = vrot.lane.b32.xlu1 %v34_v3, %s859_s17  ;;  %85 = vrot.lane.b32.xlu0 %v890_v1, %s859_s17 }
   0xe   :  { %59 = vrot.lane.b32.xlu1 %v890_v1, %s857_s13  ;;  %35 = vrot.lane.b32.xlu0 %v33_v5, %s858_s14 }
  0x12   :  { %41 = vrot.lane.b32.xlu1 %v54_v0, %s858_s14  ;;  %83 = vrot.lane.b32.xlu0 %v33_v5, %s859_s17 }
  0x16   :  { %89 = vrot.lane.b32.xlu1 %v54_v0, %s859_s17  ;;  %65 = vrot.lane.b32.xlu0 %v58_v6, %s857_s13 }
  0x1a   :  { %111 = vrot.lane.b32.xlu1 %v54_v0, %s861_s18  ;;  %109 = vrot.lane.b32.xlu0 %v57_v2, %s861_s18 }
  0x1e   :  { %135 = vrot.lane.b32.xlu1 %v34_v3, %s862_s19  ;;  %133 = vrot.lane.b32.xlu0 %v890_v1, %s862_s19 }
  0x22   :  { %159 = vrot.lane.b32.xlu1 %v54_v0, %s863_s20  ;;  %157 = vrot.lane.b32.xlu0 %v57_v2, %s863_s20 }
  0x26   :  { %183 = vrot.lane.b32.xlu1 %v34_v3, %s864_s21  ;;  %181 = vrot.lane.b32.xlu0 %v890_v1, %s864_s21 }
  0x2a   :  { %131 = vrot.lane.b32.xlu1 %v33_v5, %s862_s19  ;;  %107 = vrot.lane.b32.xlu0 %v890_v1, %s861_s18 }
  0x2e   :  { %179 = vrot.lane.b32.xlu1 %v33_v5, %s864_s21  ;;  %155 = vrot.lane.b32.xlu0 %v890_v1, %s863_s20 }
  0x32   :  { %137 = vrot.lane.b32.xlu1 %v54_v0, %s862_s19  ;;  %113 = vrot.lane.b32.xlu0 %v58_v6, %s861_s18 }
  0x36   :  { %185 = vrot.lane.b32.xlu1 %v54_v0, %s864_s21  ;;  %161 = vrot.lane.b32.xlu0 %v58_v6, %s863_s20 }
  0x3a   :  { %207 = vrot.lane.b32.xlu1 %v54_v0, %s867_s24  ;;  %205 = vrot.lane.b32.xlu0 %v57_v2, %s867_s24 }
  0x3e   :  { %404 = vrot.lane.b32.xlu1 %v399_v12, %s858_s14  ;;  %402 = vrot.lane.b32.xlu0 %v948_v13, %s858_s14 }
  0x42   :  { %427 = vrot.lane.b32.xlu1 %v751_v11, %s857_s13  ;;  %425 = vrot.lane.b32.xlu0 %v421_v14, %s857_s13 }
  0x46   :  { %450 = vrot.lane.b32.xlu1 %v399_v12, %s859_s17  ;;  %448 = vrot.lane.b32.xlu0 %v948_v13, %s859_s17 }
  0x4a   :  { %400 = vrot.lane.b32.xlu1 %v398_v15, %s858_s14  ;;  %203 = vrot.lane.b32.xlu0 %v890_v1, %s867_s24 }
  0x4e   :  { %446 = vrot.lane.b32.xlu1 %v398_v15, %s859_s17  ;;  %423 = vrot.lane.b32.xlu0 %v948_v13, %s857_s13 }
  0x52   :  { %406 = vrot.lane.b32.xlu1 %v751_v11, %s858_s14  ;;  %209 = vrot.lane.b32.xlu0 %v58_v6, %s867_s24 }
  0x56   :  { %452 = vrot.lane.b32.xlu1 %v751_v11, %s859_s17  ;;  %429 = vrot.lane.b32.xlu0 %v422_v16, %s857_s13 }
  0x5a   :  { %473 = vrot.lane.b32.xlu1 %v751_v11, %s861_s18  ;;  %471 = vrot.lane.b32.xlu0 %v421_v14, %s861_s18 }
  0x5e   :  { %496 = vrot.lane.b32.xlu1 %v399_v12, %s862_s19  ;;  %494 = vrot.lane.b32.xlu0 %v948_v13, %s862_s19 }
  0x62   :  { %519 = vrot.lane.b32.xlu1 %v751_v11, %s863_s20  ;;  %517 = vrot.lane.b32.xlu0 %v421_v14, %s863_s20 }
  0x66   :  { %542 = vrot.lane.b32.xlu1 %v399_v12, %s864_s21  ;;  %540 = vrot.lane.b32.xlu0 %v948_v13, %s864_s21 }
  0x6a   :  { %492 = vrot.lane.b32.xlu1 %v398_v15, %s862_s19  ;;  %469 = vrot.lane.b32.xlu0 %v948_v13, %s861_s18 }
  0x6e   :  { %538 = vrot.lane.b32.xlu1 %v398_v15, %s864_s21  ;;  %515 = vrot.lane.b32.xlu0 %v948_v13, %s863_s20 }
  0x72   :  { %498 = vrot.lane.b32.xlu1 %v751_v11, %s862_s19  ;;  %475 = vrot.lane.b32.xlu0 %v422_v16, %s861_s18 }
  0x74   :  { %v64_v17 = vpop.permute.xlu1 %63  ;;  %v38_v18 = vpop.permute.xlu0 %37 }
  0x76   :  { %544 = vrot.lane.b32.xlu1 %v751_v11, %s864_s21  ;;  %521 = vrot.lane.b32.xlu0 %v422_v16, %s863_s20 }
  0x78   :  { %v62_v19 = vpop.permute.xlu1 %61  ;;  %v40_v20 = vpop.permute.xlu0 %39 }
  0x79   :  { %v69_v21 = vsel %vm67_vm2, %v62_v19, %v64_v17  ;;  %v45_v22 = vsel %vm43_vm3, %v38_v18, %v40_v20 }
  0x7a   :  { %75 = vst [vmem:[#allocation2 + $0x20] sm:$0xf] %v69_v21  ;;  %51 = vst [vmem:[#allocation2 + $0x8] sm:$0xf0] %v45_v22  ;;  %565 = vrot.lane.b32.xlu1 %v751_v11, %s867_s24  ;;  %563 = vrot.lane.b32.xlu0 %v421_v14, %s867_s24 }
  0x7c   :  { %v88_v23 = vpop.permute.xlu1 %87  ;;  %v86_v24 = vpop.permute.xlu0 %85 }
  0x7d   :  { %v93_v25 = vsel %vm91_vm4, %v86_v24, %v88_v23 }
  0x7e   :  { %99 = vst [vmem:[#allocation2 + $0x20] sm:$0xf0] %v93_v25  ;;  %567 = vrot.lane.b32.xlu1 %v422_v16, %s867_s24  ;;  %561 = vrot.lane.b32.xlu0 %v948_v13, %s867_s24 }
  0x80   :  { %v60_v26 = vpop.permute.xlu1 %59  ;;  %v36_v27 = vpop.permute.xlu0 %35 }
  0x81   :  { %v68_v28 = vsel %vm67_vm2, %v60_v26, %v62_v19  ;;  %v44_v29 = vsel %vm43_vm3, %v36_v27, %v38_v18  ;;  %v223_v30 = vld [vmem:[#allocation2 + $0x8] sm:$0xff] }
  0x82   :  { %74 = vst [vmem:[#allocation2 + $0x18] sm:$0xf] %v68_v28  ;;  %50 = vst [vmem:[#allocation2] sm:$0xf0] %v44_v29 }
  0x83   :  { %392 = vst [vmem:[#allocation2 + $0x8] sm:$0xf] %v421_v14 }
  0x84   :  { %v42_v31 = vpop.permute.xlu1 %41  ;;  %v84_v32 = vpop.permute.xlu0 %83 }
  0x85   :  { %v46_v33 = vsel %vm43_vm3, %v40_v20, %v42_v31  ;;  %v92_v34 = vsel %vm91_vm4, %v84_v32, %v86_v24  ;;  %v226_v35 = vld [vmem:[#allocation2 + $0x20] sm:$0xff] }
  0x86   :  { %52 = vst [vmem:[#allocation2 + $0x10] sm:$0xf0] %v46_v33  ;;  %98 = vst [vmem:[#allocation2 + $0x18] sm:$0xf0] %v92_v34  ;;  %v809_v36 = vpack.c.bf16 %v226_v35, %v223_v30 }
  0x88   :  { %v90_v37 = vpop.permute.xlu1 %89  ;;  %v66_v38 = vpop.permute.xlu0 %65  ;;  %810 = vmatprep.subr.bf16.mxu0 %v809_v36 }
  0x89   :  { %v94_v39 = vsel %vm91_vm4, %v88_v23, %v90_v37  ;;  %v70_v40 = vsel %vm67_vm2, %v64_v17, %v66_v38  ;;  %v222_v41 = vld [vmem:[#allocation2] sm:$0xff] }
  0x8a   :  { %100 = vst [vmem:[#allocation2 + $0x28] sm:$0xf0] %v94_v39  ;;  %76 = vst [vmem:[#allocation2 + $0x28] sm:$0xf] %v70_v40 }
  0x8b   :  { %391 = vst [vmem:[#allocation2] sm:$0xf] %v948_v13 }
  0x8c   :  { %v112_v43 = vpop.permute.xlu1 %111  ;;  %v110_v44 = vpop.permute.xlu0 %109 }
  0x8d   :  { %v117_v45 = vsel %vm115_vm5, %v110_v44, %v112_v43  ;;  %v225_v46 = vld [vmem:[#allocation2 + $0x18] sm:$0xff]  ;;  %v224_v47 = vld [vmem:[#allocation2 + $0x10] sm:$0xff] }
  0x8e   :  { %123 = vst [vmem:[#allocation2 + $0x38] sm:$0xf] %v117_v45  ;;  %v811_v48 = vpack.c.bf16 %v225_v46, %v222_v41  ;;  %393 = vst [vmem:[#allocation2 + $0x10] sm:$0xf] %v749_v42 }
  0x90   :  { %v136_v49 = vpop.permute.xlu1 %135  ;;  %v134_v50 = vpop.permute.xlu0 %133  ;;  %812 = vmatpush1.bf16.msra.mxu0 %v811_v48  ;;  %v1037_v48 = vld [vmem:[%s1091_s1] sm:$0xff] }
  0x91   :  { %v141_v51 = vsel %vm139_vm6, %v134_v50, %v136_v49  ;;  %v227_v52 = vld [vmem:[#allocation2 + $0x28] sm:$0xff] }
  0x92   :  { %147 = vst [vmem:[#allocation2 + $0x38] sm:$0xf0] %v141_v51  ;;  %v818_v53 = vpack.c.bf16 %v227_v52, %v224_v47 }
  0x94   :  { %v160_v54 = vpop.permute.xlu1 %159  ;;  %v158_v55 = vpop.permute.xlu0 %157  ;;  %819 = vmatpush3.bf16.msra.mxu1 %v818_v53 }
  0x95   :  { %v165_v56 = vsel %vm163_vm7, %v158_v55, %v160_v54  ;;  %820 = vmatprep.subr.bf16.mxu1 %v860_v7 }
  0x96   :  { %171 = vst [vmem:[#allocation2 + $0x50] sm:$0xf] %v165_v56 }
  0x98   :  { %v184_v57 = vpop.permute.xlu1 %183  ;;  %v182_v58 = vpop.permute.xlu0 %181 }
  0x99   :  { %v189_v59 = vsel %vm187_vm8, %v182_v58, %v184_v57  ;;  %v229_v4 = vld [vmem:[#allocation2 + $0x38] sm:$0xff] }
  0x9a   :  { %195 = vst [vmem:[#allocation2 + $0x50] sm:$0xf0] %v189_v59 }
  0x9c   :  { %v132_v60 = vpop.permute.xlu1 %131  ;;  %v108_v61 = vpop.permute.xlu0 %107 }
  0x9d   :  { %v140_v62 = vsel %vm139_vm6, %v132_v60, %v134_v50  ;;  %v116_v63 = vsel %vm115_vm5, %v108_v61, %v110_v44 }
  0x9e   :  { %146 = vst [vmem:[#allocation2 + $0x30] sm:$0xf0] %v140_v62  ;;  %122 = vst [vmem:[#allocation2 + $0x30] sm:$0xf] %v116_v63 }
  0xa0   :  { %v180_v0 = vpop.permute.xlu1 %179  ;;  %v156_v1 = vpop.permute.xlu0 %155 }
  0xa1   :  { %v188_v2 = vsel %vm187_vm8, %v180_v0, %v182_v58  ;;  %v164_v3 = vsel %vm163_vm7, %v156_v1, %v158_v55  ;;  %v232_v5 = vld [vmem:[#allocation2 + $0x50] sm:$0xff] }
  0xa2   :  { %194 = vst [vmem:[#allocation2 + $0x48] sm:$0xf0] %v188_v2  ;;  %170 = vst [vmem:[#allocation2 + $0x48] sm:$0xf] %v164_v3  ;;  %v813_v6 = vpack.c.bf16 %v232_v5, %v229_v4 }
  0xa4   :  { %v138_v8 = vpop.permute.xlu1 %137  ;;  %v114_v9 = vpop.permute.xlu0 %113  ;;  %814 = vmatprep.subr.bf16.mxu0 %v813_v6 }
  0xa5   :  { %v142_v11 = vsel %vm139_vm6, %v136_v49, %v138_v8  ;;  %v118_v12 = vsel %vm115_vm5, %v112_v43, %v114_v9  ;;  %v228_v17 = vld [vmem:[#allocation2 + $0x30] sm:$0xff] }
  0xa6   :  { %148 = vst [vmem:[#allocation2 + $0x40] sm:$0xf0] %v142_v11  ;;  %124 = vst [vmem:[#allocation2 + $0x40] sm:$0xf] %v118_v12 }
  0xa8   :  { %v186_v13 = vpop.permute.xlu1 %185  ;;  %v162_v14 = vpop.permute.xlu0 %161 }
  0xa9   :  { %v190_v15 = vsel %vm187_vm8, %v184_v57, %v186_v13  ;;  %v166_v16 = vsel %vm163_vm7, %v160_v54, %v162_v14  ;;  %v231_v18 = vld [vmem:[#allocation2 + $0x48] sm:$0xff] }
  0xaa   :  { %196 = vst [vmem:[#allocation2 + $0x58] sm:$0xf0] %v190_v15  ;;  %172 = vst [vmem:[#allocation2 + $0x58] sm:$0xf] %v166_v16  ;;  %v815_v19 = vpack.c.bf16 %v231_v18, %v228_v17 }
  0xac   :  { %v208_v20 = vpop.permute.xlu1 %207  ;;  %v206_v21 = vpop.permute.xlu0 %205  ;;  %816 = vmatpush1.bf16.msra.mxu0 %v815_v19 }
  0xad   :  { %v213_v22 = vsel %vm211_vm9, %v206_v21, %v208_v20  ;;  %v230_v26 = vld [vmem:[#allocation2 + $0x40] sm:$0xff] }
  0xae   :  { %219 = vst [vmem:[#allocation2 + $0x68] sm:$0xf] %v213_v22 }
  0xb0   :  { %v405_v23 = vpop.permute.xlu1 %404  ;;  %v403_v24 = vpop.permute.xlu0 %402 }
  0xb1   :  { %v409_v25 = vsel %vm43_vm3, %v403_v24, %v405_v23  ;;  %v233_v27 = vld [vmem:[#allocation2 + $0x58] sm:$0xff] }
  0xb2   :  { %415 = vst [vmem:[#allocation2 + $0x8] sm:$0xf0] %v409_v25  ;;  %v821_v28 = vpack.c.bf16 %v233_v27, %v230_v26 }
  0xb4   :  { %v428_v29 = vpop.permute.xlu1 %427  ;;  %v426_v30 = vpop.permute.xlu0 %425  ;;  %822 = vmatpush3.bf16.msra.mxu1 %v821_v28 }
  0xb5   :  { %v432_v31 = vsel %vm67_vm2, %v426_v30, %v428_v29  ;;  %v235_v32 = vld [vmem:[#allocation2 + $0x68] sm:$0xff]  ;;  %791 = vmatprep.subr.mxu1 %v866_v10 }
  0xb6   :  { %438 = vst [vmem:[#allocation2 + $0x20] sm:$0xf] %v432_v31  ;;  %249 = vmatprep.subr.mxu0 %v235_v32 }
  0xb8   :  { %v451_v33 = vpop.permute.xlu1 %450  ;;  %v449_v34 = vpop.permute.xlu0 %448 }
  0xb9   :  { %v455_v35 = vsel %vm91_vm4, %v449_v34, %v451_v33  ;;  %v580_v47 = vld [vmem:[#allocation2 + $0x8] sm:$0xff] }
  0xba   :  { %461 = vst [vmem:[#allocation2 + $0x20] sm:$0xf0] %v455_v35 }
  0xbc   :  { %v401_v36 = vpop.permute.xlu1 %400  ;;  %v204_v37 = vpop.permute.xlu0 %203 }
  0xbd   :  { %v408_v38 = vsel %vm43_vm3, %v401_v36, %v403_v24  ;;  %v212_v39 = vsel %vm211_vm9, %v204_v37, %v206_v21 }
  0xbe   :  { %414 = vst [vmem:[#allocation2] sm:$0xf0] %v408_v38  ;;  %218 = vst [vmem:[#allocation2 + $0x60] sm:$0xf] %v212_v39 }
  0xc0   :  { %v447_v40 = vpop.permute.xlu1 %446  ;;  %v424_v41 = vpop.permute.xlu0 %423 }
  0xc1   :  { %v454_v42 = vsel %vm91_vm4, %v447_v40, %v449_v34  ;;  %v431_v43 = vsel %vm67_vm2, %v424_v41, %v426_v30  ;;  %v583_v44 = vld [vmem:[#allocation2 + $0x20] sm:$0xff] }
  0xc2   :  { %460 = vst [vmem:[#allocation2 + $0x18] sm:$0xf0] %v454_v42  ;;  %437 = vst [vmem:[#allocation2 + $0x18] sm:$0xf] %v431_v43  ;;  %v823_v52 = vpack.c.bf16 %v583_v44, %v580_v47 }
  0xc4   :  { %v407_v45 = vpop.permute.xlu1 %406  ;;  %v210_v46 = vpop.permute.xlu0 %209 }
  0xc5   :  { %v410_v49 = vsel %vm43_vm3, %v405_v23, %v407_v45  ;;  %v214_v50 = vsel %vm211_vm9, %v208_v20, %v210_v46  ;;  %v234_v51 = vld [vmem:[#allocation2 + $0x60] sm:$0xff] }
  0xc6   :  { %416 = vst [vmem:[#allocation2 + $0x10] sm:$0xf0] %v410_v49  ;;  %220 = vst [vmem:[#allocation2 + $0x70] sm:$0xf] %v214_v50  ;;  %250 = vmatpush1.msra.mxu0 %v234_v51  ;;  %v579_v57 = vld [vmem:[#allocation2] sm:$0xff] }
  0xc7   :  { %824 = vmatprep.subr.bf16.mxu0 %v823_v52  ;;  %746 = vmatmul.mubr.msk.f32.vlgmr.msra.gmra.mrb[0].mxu0 %vm237_vm10, %v1037_v48 }
  0xc8   :  { %v453_v53 = vpop.permute.xlu1 %452  ;;  %v430_v54 = vpop.permute.xlu0 %429  ;;  %661 = vmatprep.mubr.f32.mxu0 %v866_v10 }
  0xc9   :  { %v456_v55 = vsel %vm91_vm4, %v451_v33, %v453_v53  ;;  %v433_v56 = vsel %vm67_vm2, %v428_v29, %v430_v54  ;;  %v582_v58 = vld [vmem:[#allocation2 + $0x18] sm:$0xff] }
  0xca   :  { %462 = vst [vmem:[#allocation2 + $0x28] sm:$0xf0] %v456_v55  ;;  %439 = vst [vmem:[#allocation2 + $0x28] sm:$0xf] %v433_v56  ;;  %v825_v59 = vpack.c.bf16 %v582_v58, %v579_v57 }
  0xcc   :  { %v474_v60 = vpop.permute.xlu1 %473  ;;  %v472_v61 = vpop.permute.xlu0 %471  ;;  %826 = vmatpush1.bf16.msra.mxu0 %v825_v59 }
  0xcd   :  { %v478_v62 = vsel %vm115_vm5, %v472_v61, %v474_v60  ;;  %v236_v63 = vld [vmem:[#allocation2 + $0x70] sm:$0xff] }
  0xce   :  { %484 = vst [vmem:[#allocation2 + $0x38] sm:$0xf] %v478_v62  ;;  %792 = vmatpush3.msra.mxu1 %v236_v63  ;;  %v581_v3 = vld [vmem:[#allocation2 + $0x10] sm:$0xff] }
  0xcf   :  { %831 = vmatprep.subr.bf16.mxu1 %v860_v7  ;;  %794 = vmatmul.mubr.msk.f32.vlgmr.msra.gmra.mrb[0].mxu1 %vm237_vm10, %v1037_v48 }
  0xd0   :  { %v497_v0 = vpop.permute.xlu1 %496  ;;  %v495_v1 = vpop.permute.xlu0 %494  ;;  %806 = vmatprep.mubr.msk.f32.mxu1 %vm868_vm1, %v866_v10 }
  0xd1   :  { %v501_v2 = vsel %vm139_vm6, %v495_v1, %v497_v0  ;;  %v584_v4 = vld [vmem:[#allocation2 + $0x28] sm:$0xff] }
  0xd2   :  { %507 = vst [vmem:[#allocation2 + $0x38] sm:$0xf0] %v501_v2  ;;  %v832_v5 = vpack.c.bf16 %v584_v4, %v581_v3 }
  0xd4   :  { %v520_v6 = vpop.permute.xlu1 %519  ;;  %v518_v8 = vpop.permute.xlu0 %517  ;;  %833 = vmatpush3.bf16.msra.mxu1 %v832_v5 }
  0xd5   :  { %v524_v9 = vsel %vm163_vm7, %v518_v8, %v520_v6  ;;  %834 = vmatprep.subr.bf16.mxu1 %v860_v7 }
  0xd6   :  { %530 = vst [vmem:[#allocation2 + $0x50] sm:$0xf] %v524_v9 }
  0xd8   :  { %v543_v11 = vpop.permute.xlu1 %542  ;;  %v541_v12 = vpop.permute.xlu0 %540 }
  0xd9   :  { %v547_v13 = vsel %vm187_vm8, %v541_v12, %v543_v11  ;;  %v586_v21 = vld [vmem:[#allocation2 + $0x38] sm:$0xff] }
  0xda   :  { %553 = vst [vmem:[#allocation2 + $0x50] sm:$0xf0] %v547_v13 }
  0xdc   :  { %v493_v14 = vpop.permute.xlu1 %492  ;;  %v470_v15 = vpop.permute.xlu0 %469 }
  0xdd   :  { %v500_v16 = vsel %vm139_vm6, %v493_v14, %v495_v1  ;;  %v477_v17 = vsel %vm115_vm5, %v470_v15, %v472_v61 }
  0xde   :  { %506 = vst [vmem:[#allocation2 + $0x30] sm:$0xf0] %v500_v16  ;;  %483 = vst [vmem:[#allocation2 + $0x30] sm:$0xf] %v477_v17 }
  0xe0   :  { %v539_v18 = vpop.permute.xlu1 %538  ;;  %v516_v19 = vpop.permute.xlu0 %515 }
  0xe1   :  { %v546_v20 = vsel %vm187_vm8, %v539_v18, %v541_v12  ;;  %v523_v7 = vsel %vm163_vm7, %v516_v19, %v518_v8  ;;  %v589_v22 = vld [vmem:[#allocation2 + $0x50] sm:$0xff] }
  0xe2   :  { %552 = vst [vmem:[#allocation2 + $0x48] sm:$0xf0] %v546_v20  ;;  %529 = vst [vmem:[#allocation2 + $0x48] sm:$0xf] %v523_v7  ;;  %v827_v23 = vpack.c.bf16 %v589_v22, %v586_v21 }
  0xe4   :  { %v499_v24 = vpop.permute.xlu1 %498  ;;  %v476_v25 = vpop.permute.xlu0 %475  ;;  %828 = vmatprep.subr.bf16.mxu0 %v827_v23 }
  0xe5   :  { %v502_v26 = vsel %vm139_vm6, %v497_v0, %v499_v24  ;;  %v479_v27 = vsel %vm115_vm5, %v474_v60, %v476_v25  ;;  %v585_v32 = vld [vmem:[#allocation2 + $0x30] sm:$0xff] }
  0xe6   :  { %508 = vst [vmem:[#allocation2 + $0x40] sm:$0xf0] %v502_v26  ;;  %485 = vst [vmem:[#allocation2 + $0x40] sm:$0xf] %v479_v27 }
  0xe8   :  { %v545_v28 = vpop.permute.xlu1 %544  ;;  %v522_v29 = vpop.permute.xlu0 %521 }
  0xe9   :  { %v548_v30 = vsel %vm187_vm8, %v543_v11, %v545_v28  ;;  %v525_v31 = vsel %vm163_vm7, %v520_v6, %v522_v29  ;;  %v588_v33 = vld [vmem:[#allocation2 + $0x48] sm:$0xff] }
  0xea   :  { %554 = vst [vmem:[#allocation2 + $0x58] sm:$0xf0] %v548_v30  ;;  %531 = vst [vmem:[#allocation2 + $0x58] sm:$0xf] %v525_v31  ;;  %v829_v34 = vpack.c.bf16 %v588_v33, %v585_v32 }
  0xec   :  { %v566_v35 = vpop.permute.xlu1 %565  ;;  %v564_v36 = vpop.permute.xlu0 %563  ;;  %830 = vmatpush1.bf16.msra.mxu0 %v829_v34 }
  0xed   :  { %v570_v37 = vsel %vm211_vm9, %v564_v36, %v566_v35  ;;  %v587_v42 = vld [vmem:[#allocation2 + $0x40] sm:$0xff] }
  0xee   :  { %576 = vst [vmem:[#allocation2 + $0x68] sm:$0xf] %v570_v37 }
  0xf0   :  { %v568_v38 = vpop.permute.xlu1 %567  ;;  %v562_v39 = vpop.permute.xlu0 %561 }
  0xf1   :  { %v571_v40 = vsel %vm211_vm9, %v566_v35, %v568_v38  ;;  %v569_v41 = vsel %vm211_vm9, %v562_v39, %v564_v36  ;;  %v590_v43 = vld [vmem:[#allocation2 + $0x58] sm:$0xff] }
  0xf2   :  { %577 = vst [vmem:[#allocation2 + $0x70] sm:$0xf] %v571_v40  ;;  %575 = vst [vmem:[#allocation2 + $0x60] sm:$0xf] %v569_v41  ;;  %v835_v44 = vpack.c.bf16 %v590_v43, %v587_v42 }
  0xf4   :  { %836 = vmatpush3.bf16.msra.mxu1 %v835_v44 }
  0xf5   :  { %v592_v45 = vld [vmem:[#allocation2 + $0x68] sm:$0xff]  ;;  %804 = vmatprep.subr.mxu1 %v866_v10 }
  0xf6   :  { %605 = vmatprep.subr.mxu0 %v592_v45 }
  0xf9   :  { %v591_v46 = vld [vmem:[#allocation2 + $0x60] sm:$0xff]  ;;  %v593_v47 = vld [vmem:[#allocation2 + $0x70] sm:$0xff] }
  0xfa   :  { %606 = vmatpush1.msra.mxu0 %v591_v46  ;;  %805 = vmatpush3.msra.mxu1 %v593_v47 }
  0xfb   :  { %766 = vmatmul.mubr.msk.f32.vlgmr.msra.gmra.mrb[2].mxu0 %vm237_vm10, %v1037_v48  ;;  %807 = vmatmul.mubr.msk.f32.vlgmr.msra.gmra.mrb[2].mxu1 %vm237_vm10, %v1037_v48 }
 0x19a   :  { %v307_v49 = vpop.f32.mrb[0].mxu0 }
 0x19b   :  { %382 = vst [vmem:[%s1092_s2] sm:$0xff] %v307_v49  ;;  %v309_v50 = vpop.f32.mrb[1].mxu0 }
 0x19c   :  { %383 = vst [vmem:[%s1092_s2 + $0x8] sm:$0xff] %v309_v50 }
 0x1a2   :  { %v378_v10 = vpop.f32.mrb[0].mxu1 }
 0x1a3   :  { %384 = vst [vmem:[%s1092_s2 + $0x10] sm:$0xff] %v378_v10  ;;  %v795_v51 = vpop.f32.mrb[1].mxu1 }
 0x1ce   :  { %v663_v52 = vpop.f32.mrb[2].mxu0  ;;  %v734_v53 = vpop.f32.mrb[2].mxu1 }
 0x1cf   :  { %768 = vst [vmem:[%s1092_s2 + $0x18] sm:$0xff] %v663_v52  ;;  %770 = vst [vmem:[%s1092_s2 + $0x28] sm:$0xff] %v734_v53  ;;  %v665_v48 = vpop.f32.mrb[3].mxu0  ;;  %v808_v54 = vpop.f32.mrb[3].mxu1 }
 0x1d0   :  { %769 = vst [vmem:[%s1092_s2 + $0x20] sm:$0xff] %v665_v48 }

</bundles_post_ra>
